<compile_context>
chip_gen: v5e
topology: v5e:2x2
jax: 0.10.0
libtpu: 0.0.40
codegen_flags: <defaults>
</compile_context>

<pallas_src>
import functools

import jax
import jax.numpy as jnp
from jax.experimental import pallas as pl
from jax.experimental.pallas import tpu as pltpu


def _wl_kernel(pred_ref, truth_ref, out_ref, *, n_const, total_rows, blk_rows):
    # pred_ref / truth_ref: (BLK, H*W) VMEM tile = BLK complete (b, c) slices.
    pred = pred_ref[...].astype(jnp.float32)
    truth = truth_ref[...].astype(jnp.float32)

    pos_mask = truth >= 0.5            # binary truth: 1.0 -> positive class
    pred_hi = pred >= 0.5

    # Per-row (per (b, c) slice) counts, matching torch.sum(..., -1), -1) for
    # binary truth.  tn is computed straight from the masks (no 1 - truth
    # full-tile temporary).
    n_p = jnp.sum(truth, axis=-1, keepdims=True)                       # (BLK, 1)
    n_n = n_const - n_p
    tp = jnp.sum(jnp.where(pred_hi, truth, 0.0), axis=-1, keepdims=True)
    tn = jnp.sum(jnp.where(jnp.logical_or(pred_hi, pos_mask), 0.0, 1.0),
                 axis=-1, keepdims=True)

    # Single transcendental per element, class-split into per-row log sums:
    #   s_p = sum_{t==1} log(pred),   s_n = sum_{t==0} log(1 - pred)
    log_term = jnp.log(jnp.where(pos_mask, pred, 1.0 - pred))           # (BLK, HW)
    s_p = jnp.sum(jnp.where(pos_mask, log_term, 0.0), axis=-1, keepdims=True)
    s_all = jnp.sum(log_term, axis=-1, keepdims=True)
    s_n = s_all - s_p                                                   # (BLK, 1)

    # Fused L1 + L2 per-row coefficients:
    #   t == 1 : -(n_n/N + 1 - tp/n_p) * log(pred)
    #   t == 0 : -(n_p/N + 1 - tn/n_n) * log(1 - pred)
    # Degenerate rows (no positives / no negatives): the matching log-sum is 0,
    # so keep the coefficient finite (documented divergence from the reference,
    # which yields NaN there).
    rate_p = tp / jnp.maximum(n_p, 1.0)
    rate_n = tn / jnp.maximum(n_n, 1.0)
    coef_p = -((n_n / n_const) + (1.0 - rate_p))                        # (BLK, 1)
    coef_n = -((n_p / n_const) + (1.0 - rate_n))                        # (BLK, 1)

    contrib = coef_p * s_p + coef_n * s_n                               # (BLK, 1)

    # Mask tail-block rows that fall past the real row count (cdiv grid).
    row_ids = jax.lax.broadcasted_iota(jnp.int32, contrib.shape, 0)
    valid = (pl.program_id(0) * blk_rows + row_ids) < total_rows
    block_sum = jnp.sum(jnp.where(valid, contrib, 0.0))

    # Lane-dense (1, 128) partial: block sum in lane 0, zeros elsewhere.
    lane = jax.lax.broadcasted_iota(jnp.int32, (1, 128), 1)
    out_ref[...] = jnp.where(lane == 0, block_sum, 0.0)


def _vmem_limit_bytes():
    """Generation-aware scoped-VMEM limit (64 MiB on 128 MiB parts, 48 on v7x)."""
    cap = 128 * 1024 * 1024
    try:
        info = pltpu.get_tpu_info()
        cap = int(getattr(info, "vmem_capacity_bytes", cap) or cap)
    except Exception:
        pass
    return max(32 * 1024 * 1024, min(64 * 1024 * 1024, (cap * 3) // 4))


def _pick_block_rows(bc, hw, pred_itemsize, truth_itemsize, vmem_limit):
    """Sublane-aligned row count per block, sized against the VMEM budget."""
    itemsize = min(pred_itemsize, truth_itemsize)
    align = 32 if itemsize == 1 else 16 if itemsize == 2 else 8
    if bc <= align:
        return bc                                   # full-dim block (tiny problem)

    # Budget: 2 inputs x 2 pipeline buffers + ~4 full-tile f32 temporaries,
    # keep ~2x headroom inside the scoped VMEM limit.
    bytes_per_row = hw * (2 * (pred_itemsize + truth_itemsize) + 4 * 4)
    max_rows = max(align, (vmem_limit // 2) // max(1, bytes_per_row))

    blk = min(bc, max_rows)
    blk = max(align, (blk // align) * align)        # full-vreg sublane packing

    # Keep at least 2 grid steps so a v7x megacore can split the parallel axis.
    if bc >= 2 * align:
        half = max(align, (((bc + 1) // 2) // align) * align)
        blk = min(blk, half)
    return blk


def wl_loss(pred, truth):
    """Pallas TPU implementation of the WL loss forward pass."""
    B, C, H, W = pred.shape
    BC, HW = B * C, H * W

    # No wrapper-side dtype casts: inputs are read in their stored dtype
    # (bf16 pred / bf16-int8 truth masks welcome) and upcast to f32 inside the
    # kernel, keeping HBM bytes-in minimal on this bandwidth-bound op.
    pred2 = pred.reshape(BC, HW)
    truth2 = truth.reshape(BC, HW)

    pred_it = jnp.dtype(pred2.dtype).itemsize
    truth_it = jnp.dtype(truth2.dtype).itemsize
    vmem_limit = _vmem_limit_bytes()
    blk = _pick_block_rows(BC, HW, pred_it, truth_it, vmem_limit)
    num_blocks = pl.cdiv(BC, blk)

    n_const = float(C * H * W)             # torch.numel(truth[0, :, :, :])
    kernel = functools.partial(_wl_kernel, n_const=n_const,
                               total_rows=BC, blk_rows=blk)

    cost = pl.CostEstimate(
        flops=12 * BC * HW,
        transcendentals=BC * HW,
        bytes_accessed=BC * HW * (pred_it + truth_it) + num_blocks * 128 * 4,
    )

    partial = pl.pallas_call(
        kernel,
        out_shape=jax.ShapeDtypeStruct((num_blocks, 128), jnp.float32),
        grid=(num_blocks,),
        in_specs=[
            pl.BlockSpec((blk, HW), lambda i: (i, 0)),
            pl.BlockSpec((blk, HW), lambda i: (i, 0)),
        ],
        out_specs=pl.BlockSpec((1, 128), lambda i: (i, 0)),
        compiler_params=pltpu.CompilerParams(
            dimension_semantics=("parallel",),      # independent blocks (v7x 2-TC)
            vmem_limit_bytes=vmem_limit,
        ),
        cost_estimate=cost,
    )(pred2, truth2)

    # mean(L1) + mean(L2) == sum(L1 + L2) / numel  (identical shapes).
    return jnp.sum(partial) / jnp.float32(B * C * H * W)


def wl_ref(pred, truth):
    """Pure-JAX reference (mirrors the PyTorch code literally)."""
    N_p = jnp.sum(truth, axis=(-2, -1), keepdims=True)
    N = jnp.float32(truth.shape[1] * truth.shape[2] * truth.shape[3])
    N_n = N - N_p
    pred_p = jnp.where(pred >= 0.5, 1.0, 2.0)
    TP = jnp.sum(jnp.where(pred_p == truth, 1.0, 0.0),
                 axis=(-2, -1), keepdims=True)
    pred_n = jnp.where(pred < 0.5, 1.0, 2.0)
    TN = jnp.sum(jnp.where(pred_n == 1.0 - truth, 1.0, 0.0),
                 axis=(-2, -1), keepdims=True)
    log_p = jnp.log(pred)
    log_1mp = jnp.log(1.0 - pred)
    L1 = -(N_n / N) * (truth * log_p) - (N_p / N) * ((1.0 - truth) * log_1mp)
    L2 = (-(1.0 - TP / N_p) * truth * log_p
          - (1.0 - TN / N_n) * (1.0 - truth) * log_1mp)
    return L1.mean() + L2.mean()


if __name__ == "__main__":
    B, C, H, W = 2, 4, 16, 16
    key = jax.random.PRNGKey(0)
    k_pred, k_truth = jax.random.split(key)

    # pred: probabilities strictly inside (0, 1) so log() is finite.
    pred = jax.random.uniform(k_pred, (B, C, H, W), jnp.float32,
                              minval=0.05, maxval=0.95)
    # truth: binary mask with (w.h.p.) both classes present per (b, c) slice.
    truth = (jax.random.uniform(k_truth, (B, C, H, W)) < 0.5).astype(jnp.float32)

    loss = wl_loss(pred, truth)
    jax.block_until_ready(loss)

    ref = wl_ref(pred, truth)
    assert jnp.isfinite(loss), "kernel produced non-finite loss"
    assert jnp.allclose(loss, ref, rtol=1e-4, atol=1e-5), (loss, ref)

    print("KERNEL_OK")
</pallas_src>

<mosaic_0001>
module attributes {stable_mosaic.version = 11 : i64} {
  func.func @_wl_kernel(%arg0: i32, %arg1: memref<8x256xf32, #tpu.memory_space<vmem>>, %arg2: memref<8x256xf32, #tpu.memory_space<vmem>>, %arg3: memref<1x128xf32, #tpu.memory_space<vmem>>) attributes {dimension_semantics = [#tpu.dimension_semantics<parallel>], iteration_bounds = array<i64: 1>, scalar_prefetch = 0 : i64, scratch_operands = 0 : i64, tpu.core_type = #tpu.core_type<tc>, window_params = [{transform_indices = @transform_0, window_bounds = array<i64: 8, 256>}, {transform_indices = @transform_1, window_bounds = array<i64: 8, 256>}, {transform_indices = @transform_2, window_bounds = array<i64: 1, 128>}]} {
    %c0 = arith.constant 0 : index
    %c0_0 = arith.constant 0 : index
    %0 = vector.load %arg1[%c0, %c0_0] : memref<8x256xf32, #tpu.memory_space<vmem>>, vector<8x256xf32>
    %c0_1 = arith.constant 0 : index
    %c0_2 = arith.constant 0 : index
    %1 = vector.load %arg2[%c0_1, %c0_2] : memref<8x256xf32, #tpu.memory_space<vmem>>, vector<8x256xf32>
    %cst = arith.constant 5.000000e-01 : f32
    %2 = vector.broadcast %cst : f32 to vector<8x256xf32>
    %3 = arith.cmpf oge, %1, %2 : vector<8x256xf32>
    %cst_3 = arith.constant 5.000000e-01 : f32
    %4 = vector.broadcast %cst_3 : f32 to vector<8x256xf32>
    %5 = arith.cmpf oge, %0, %4 : vector<8x256xf32>
    %cst_4 = arith.constant dense<0.000000e+00> : vector<8xf32>
    %6 = vector.multi_reduction <add>, %1, %cst_4 [1] : vector<8x256xf32> to vector<8xf32>
    %7 = vector.shape_cast %6 : vector<8xf32> to vector<8x1xf32>
    %cst_5 = arith.constant 1.024000e+03 : f32
    %8 = vector.broadcast %cst_5 : f32 to vector<8x1xf32>
    %9 = arith.subf %8, %7 : vector<8x1xf32>
    %cst_6 = arith.constant 0.000000e+00 : f32
    %10 = vector.broadcast %cst_6 : f32 to vector<8x256xf32>
    %11 = arith.select %5, %1, %10 : vector<8x256xi1>, vector<8x256xf32>
    %cst_7 = arith.constant dense<0.000000e+00> : vector<8xf32>
    %12 = vector.multi_reduction <add>, %11, %cst_7 [1] : vector<8x256xf32> to vector<8xf32>
    %13 = vector.shape_cast %12 : vector<8xf32> to vector<8x1xf32>
    %14 = arith.ori %5, %3 : vector<8x256xi1>
    %cst_8 = arith.constant 0.000000e+00 : f32
    %cst_9 = arith.constant 1.000000e+00 : f32
    %15 = vector.broadcast %cst_8 : f32 to vector<8x256xf32>
    %16 = vector.broadcast %cst_9 : f32 to vector<8x256xf32>
    %17 = arith.select %14, %15, %16 : vector<8x256xi1>, vector<8x256xf32>
    %cst_10 = arith.constant dense<0.000000e+00> : vector<8xf32>
    %18 = vector.multi_reduction <add>, %17, %cst_10 [1] : vector<8x256xf32> to vector<8xf32>
    %19 = vector.shape_cast %18 : vector<8xf32> to vector<8x1xf32>
    %cst_11 = arith.constant 1.000000e+00 : f32
    %20 = vector.broadcast %cst_11 : f32 to vector<8x256xf32>
    %21 = arith.subf %20, %0 : vector<8x256xf32>
    %22 = arith.select %3, %0, %21 : vector<8x256xi1>, vector<8x256xf32>
    %23 = math.log %22 : vector<8x256xf32>
    %cst_12 = arith.constant 0.000000e+00 : f32
    %24 = vector.broadcast %cst_12 : f32 to vector<8x256xf32>
    %25 = arith.select %3, %23, %24 : vector<8x256xi1>, vector<8x256xf32>
    %cst_13 = arith.constant dense<0.000000e+00> : vector<8xf32>
    %26 = vector.multi_reduction <add>, %25, %cst_13 [1] : vector<8x256xf32> to vector<8xf32>
    %27 = vector.shape_cast %26 : vector<8xf32> to vector<8x1xf32>
    %cst_14 = arith.constant dense<0.000000e+00> : vector<8xf32>
    %28 = vector.multi_reduction <add>, %23, %cst_14 [1] : vector<8x256xf32> to vector<8xf32>
    %29 = vector.shape_cast %28 : vector<8xf32> to vector<8x1xf32>
    %30 = arith.subf %29, %27 : vector<8x1xf32>
    %cst_15 = arith.constant 1.000000e+00 : f32
    %31 = vector.broadcast %cst_15 : f32 to vector<8x1xf32>
    %32 = arith.maximumf %7, %31 : vector<8x1xf32>
    %33 = arith.divf %13, %32 : vector<8x1xf32>
    %cst_16 = arith.constant 1.000000e+00 : f32
    %34 = vector.broadcast %cst_16 : f32 to vector<8x1xf32>
    %35 = arith.maximumf %9, %34 : vector<8x1xf32>
    %36 = arith.divf %19, %35 : vector<8x1xf32>
    %cst_17 = arith.constant 1.024000e+03 : f32
    %37 = vector.broadcast %cst_17 : f32 to vector<8x1xf32>
    %38 = arith.divf %9, %37 : vector<8x1xf32>
    %cst_18 = arith.constant 1.000000e+00 : f32
    %39 = vector.broadcast %cst_18 : f32 to vector<8x1xf32>
    %40 = arith.subf %39, %33 : vector<8x1xf32>
    %41 = arith.addf %38, %40 : vector<8x1xf32>
    %cst_19 = arith.constant 0.000000e+00 : f32
    %42 = vector.broadcast %cst_19 : f32 to vector<8x1xf32>
    %43 = arith.subf %42, %41 : vector<8x1xf32>
    %cst_20 = arith.constant 1.024000e+03 : f32
    %44 = vector.broadcast %cst_20 : f32 to vector<8x1xf32>
    %45 = arith.divf %7, %44 : vector<8x1xf32>
    %cst_21 = arith.constant 1.000000e+00 : f32
    %46 = vector.broadcast %cst_21 : f32 to vector<8x1xf32>
    %47 = arith.subf %46, %36 : vector<8x1xf32>
    %48 = arith.addf %45, %47 : vector<8x1xf32>
    %cst_22 = arith.constant 0.000000e+00 : f32
    %49 = vector.broadcast %cst_22 : f32 to vector<8x1xf32>
    %50 = arith.subf %49, %48 : vector<8x1xf32>
    %51 = arith.mulf %43, %27 : vector<8x1xf32>
    %52 = arith.mulf %50, %30 : vector<8x1xf32>
    %53 = arith.addf %51, %52 : vector<8x1xf32>
    %54 = tpu.iota {dimensions = array<i32: 0>} : vector<8x1xi32>
    %c8_i32 = arith.constant 8 : i32
    %55 = arith.muli %arg0, %c8_i32 : i32
    %56 = vector.broadcast %55 : i32 to vector<8x1xi32>
    %57 = arith.addi %56, %54 : vector<8x1xi32>
    %c8_i32_23 = arith.constant 8 : i32
    %58 = vector.broadcast %c8_i32_23 : i32 to vector<8x1xi32>
    %59 = arith.cmpi slt, %57, %58 : vector<8x1xi32>
    %cst_24 = arith.constant 0.000000e+00 : f32
    %60 = vector.broadcast %cst_24 : f32 to vector<8x1xf32>
    %61 = arith.select %59, %53, %60 : vector<8x1xi1>, vector<8x1xf32>
    %62 = vector.shape_cast %61 : vector<8x1xf32> to vector<1x8x1xf32>
    %cst_25 = arith.constant dense<0.000000e+00> : vector<1xf32>
    %63 = vector.multi_reduction <add>, %62, %cst_25 [1, 2] : vector<1x8x1xf32> to vector<1xf32>
    %64 = vector.shape_cast %63 : vector<1xf32> to vector<1x1x1xf32>
    %65 = vector.extract %64[0, 0, 0] : f32 from vector<1x1x1xf32>
    %66 = tpu.iota {dimensions = array<i32: 1>} : vector<1x128xi32>
    %c0_i32 = arith.constant 0 : i32
    %67 = vector.broadcast %c0_i32 : i32 to vector<1x128xi32>
    %68 = arith.cmpi eq, %66, %67 : vector<1x128xi32>
    %cst_26 = arith.constant 0.000000e+00 : f32
    %69 = vector.broadcast %65 : f32 to vector<1x128xf32>
    %70 = vector.broadcast %cst_26 : f32 to vector<1x128xf32>
    %71 = arith.select %68, %69, %70 : vector<1x128xi1>, vector<1x128xf32>
    %c0_27 = arith.constant 0 : index
    %c0_28 = arith.constant 0 : index
    %72 = vector.load %arg3[%c0_27, %c0_28] : memref<1x128xf32, #tpu.memory_space<vmem>>, vector<1x128xf32>
    tpu.vector_store %arg3[%c0_27, %c0_28], %71 {strides = array<i32>} : memref<1x128xf32, #tpu.memory_space<vmem>>, vector<1x128xf32>,
    return
  }
  func.func @transform_0(%arg0: i32) -> (i32, i32) {
    %c0_i32 = arith.constant 0 : i32
    %c0_i32_0 = arith.constant 0 : i32
    return %arg0, %c0_i32 : i32, i32
  }
  func.func @transform_1(%arg0: i32) -> (i32, i32) {
    %c0_i32 = arith.constant 0 : i32
    %c0_i32_0 = arith.constant 0 : i32
    return %arg0, %c0_i32 : i32, i32
  }
  func.func @transform_2(%arg0: i32) -> (i32, i32) {
    %c0_i32 = arith.constant 0 : i32
    %c0_i32_0 = arith.constant 0 : i32
    return %arg0, %c0_i32 : i32, i32
  }
}

</mosaic_0001>

<bundles_post_ra>
// kernel: tpu_custom_call.1
= control target key start
LH: loop header
LB: loop body
LE: loop exit
PB: predicated region body
PF: predicated region fallthrough
CT: control target
= control target key end

     0   :  { %7 = vsyncpa [#allocation3], 0  ;;  %s303_s0 = inlined_call_operand.hbm [shape: f32[8,256], index: 0, kind: input, shape index: {}]   ;;  %s304_s1 = inlined_call_operand.hbm [shape: f32[8,256], index: 1, kind: input, shape index: {}]   ;;  %s305_s2 = inlined_call_operand.hbm [shape: f32[1,128], index: 2, kind: output, shape index: {}]  }
   0x1   :  { %8 = vsyncpa [#allocation6], 0 }
   0x2   :  { %9 = vsyncpa [#allocation4], 0  ;;  %s15_s11 = sshll.u32 %s303_s0, 4  ;;  %s268_s12 = smov [#allocation2]   ;;  %s16_s11 = int_to_ptr.hbm [resolvable:$true] %s15_s11 }
   0x3   :  { %s17_s13 = sshll.u32 %s268_s12, 4  ;;  %s26_s16 = sshll.u32 %s304_s1, 4  ;;  %s18_s13 = int_to_ptr.vmem [resolvable:$true] %s17_s13  ;;  %s27_s16 = int_to_ptr.hbm [resolvable:$true] %s26_s16 }
   0x4   :  { %20 = dma.hbm_to_vmem [thread:$0]  %s16_s11, 256, %s18_s13, [#allocation3]  }
   0x5   :  { %s269_s17 = smov [#allocation5]  }
   0x6   :  { %s28_s18 = sshll.u32 %s269_s17, 4  ;;  %s29_s18 = int_to_ptr.vmem [resolvable:$true] %s28_s18 }
   0x7   :  { %31 = dma.hbm_to_vmem [thread:$0]  %s27_s16, 256, %s29_s18, [#allocation6]  }
   0x8   :  { %262 = dma.done.wait [#allocation3], 256  }
   0x9   :  { %263 = vsyncadd [#allocation3], 4294967040 }
   0xa   :  { %264 = dma.done.wait [#allocation6], 256  }
   0xb   :  { %265 = vsyncadd [#allocation6], 4294967040  ;;  %v42_v0 = vld [vmem:[#allocation5] sm:$0xff]  ;;  %v43_v1 = vld [vmem:[#allocation5 + $0x8] sm:$0xff]  ;;  %v270_v7 = vmov 1.0   ;;  %v271_v24 = vmov 1024.0  }
   0xc   :  { %v40_v2 = vld [vmem:[#allocation2] sm:$0xff]  ;;  %v48_v3 = vadd.f32 %v43_v1, %v42_v0  ;;  %v41_v4 = vld [vmem:[#allocation2 + $0x8] sm:$0xff]  ;;  %vm44_vm0 = vcmp.ge.f32.partialorder %v42_v0, 0.5  ;;  %vm45_vm1 = vcmp.ge.f32.partialorder %v43_v1, 0.5  ;;  %vm138_vm15 = vcmask 7168   ;;  %s272_s0 = smov [#allocation7]  }
   0xd   :  { %vm46_vm2 = vcmp.ge.f32.partialorder %v40_v2, 0.5  ;;  %vm47_vm3 = vcmp.ge.f32.partialorder %v41_v4, 0.5  ;;  %v64_v5 = vsub.f32 1.0, %v40_v2  ;;  %v65_v6 = vsub.f32 1.0, %v41_v4  ;;  %s160_s1 = sshll.u32 %s272_s0, 4  ;;  %s162_s21 = sshll.u32 %s305_s2, 4  ;;  %s161_s1 = int_to_ptr.vmem [resolvable:$true] %s160_s1  ;;  %s163_s21 = int_to_ptr.hbm [resolvable:$true] %s162_s21 }
   0xe   :  { %vm57_vm4 = vmor %vm46_vm2, %vm44_vm0  ;;  %49 = vadd.xlane.f32.xlu0 %v48_v3  ;;  %v52_v9 = vsel %vm46_vm2, %v42_v0, 0.0  ;;  %v53_v11 = vsel %vm47_vm3, %v43_v1, 0.0 }
   0xf   :  { %vm58_vm5 = vmor %vm47_vm3, %vm45_vm1  ;;  %v59_v8 = vsel %vm57_vm4, 0.0, %v270_v7  ;;  %v66_v12 = vsel %vm44_vm0, %v40_v2, %v64_v5  ;;  %v67_v13 = vsel %vm45_vm1, %v41_v4, %v65_v6  ;;  %v54_v15 = vadd.f32 %v53_v11, %v52_v9 }
  0x10   :  { %v60_v10 = vsel %vm58_vm5, 0.0, %v270_v7  ;;  %180 = vlog2.f32 %v66_v12 }
  0x11   :  { %v61_v14 = vadd.f32 %v60_v10, %v59_v8  ;;  %182 = vlog2.f32 %v67_v13 }
  0x12   :  { %184 = vrcp.f32 %v271_v24 }
  0x13   :  { %62 = vadd.xlane.f32.xlu1 %v61_v14 }
  0x16   :  { %v181_v16 = vpop.eup %180  ;;  %55 = vadd.xlane.f32.xlu0 %v54_v15 }
  0x17   :  { %v183_v17 = vpop.eup %182  ;;  %v69_v18 = vmul.f32 0.6931472, %v181_v16 }
  0x18   :  { %v71_v19 = vmul.f32 0.6931472, %v183_v17  ;;  %v185_v28 = vpop.eup %184  ;;  %v149_v17 = vlaneseq }
  0x19   :  { %v72_v20 = vsel %vm44_vm0, %v69_v18, 0.0  ;;  %v114_v30 = vmul.f32 1024.0, %v185_v28  ;;  %vm118_vm9 = vweird.f32 %v185_v28 }
  0x1a   :  { %v77_v21 = vadd.f32 %v71_v19, %v69_v18  ;;  %v73_v22 = vsel %vm45_vm1, %v71_v19, 0.0  ;;  %v150_v18 = vand.u32 127, %v149_v17 }
  0x1b   :  { %v74_v23 = vadd.f32 %v73_v22, %v72_v20  ;;  %v115_v32 = vsub.f32 1.0, %v114_v30 }
  0x1c   :  { %78 = vadd.xlane.f32.xlu2 %v77_v21  ;;  %vm151_vm0 = vcmp.eq.s32.totalorder %v150_v18, 0 }
  0x1d   :  { %75 = vadd.xlane.f32.xlu1 %v74_v23  ;;  %v116_v37 = vmul.f32 %v185_v28, %v115_v32 }
  0x1f   :  { %v117_v47 = vadd.f32 %v185_v28, %v116_v37 }
  0x21   :  { %v119_v56 = vsel %vm118_vm9, %v185_v28, %v117_v47 }
  0x81   :  { %v50_v25 = vpop.xlane.xlu0 %49 }
  0x82   :  { %v51_v26 = vsub.f32 1024.0, %v50_v25  ;;  %v81_v27 = vmax.f32 %v50_v25, 1.0  ;;  %v124_v63 = vmul.f32 %v119_v56, %v50_v25 }
  0x84   :  { %186 = vrcp.f32 %v81_v27  ;;  %v97_v29 = vmax.f32 %v51_v26, 1.0  ;;  %v93_v39 = vand.u32 2147483648, %v81_v27  ;;  %v91_v42 = vand.u32 2147483647, %v81_v27 }
  0x85   :  { %vm87_vm7 = vweird.f32 %v81_v27  ;;  %v120_v60 = vmul.f32 %v119_v56, %v51_v26 }
  0x86   :  { %188 = vrcp.f32 %v97_v29  ;;  %v63_v38 = vpop.xlane.xlu1 %62  ;;  %v109_v43 = vand.u32 2147483648, %v97_v29  ;;  %v107_v45 = vand.u32 2147483647, %v97_v29  ;;  %v94_v48 = vor.u32 1.1754944e-38, %v93_v39 }
  0x87   :  { %vm103_vm11 = vweird.f32 %v97_v29  ;;  %vm92_vm12 = vcmp.eq.f32.partialorder %v91_v42, 8.507059e+37 }
  0x88   :  { %v110_v52 = vor.u32 1.1754944e-38, %v109_v43  ;;  %vm108_vm14 = vcmp.eq.f32.partialorder %v107_v45, 8.507059e+37 }
  0x89   :  { %v56_v49 = vpop.xlane.xlu0 %55 }
  0x8a   :  { %v187_v31 = vpop.eup %186 }
  0x8b   :  { %v83_v33 = vmul.f32 %v187_v31, %v81_v27  ;;  %vm88_vm6 = vweird.f32 %v187_v31 }
  0x8c   :  { %v189_v34 = vpop.eup %188  ;;  %vm89_vm10 = vmor %vm87_vm7, %vm88_vm6 }
  0x8d   :  { %v99_v35 = vmul.f32 %v189_v34, %v97_v29  ;;  %v84_v36 = vsub.f32 1.0, %v83_v33  ;;  %vm104_vm8 = vweird.f32 %v189_v34 }
  0x8e   :  { %vm105_vm13 = vmor %vm103_vm11, %vm104_vm8 }
  0x8f   :  { %v100_v40 = vsub.f32 1.0, %v99_v35  ;;  %v85_v41 = vmul.f32 %v187_v31, %v84_v36  ;;  %v79_v61 = vpop.xlane.xlu2 %78 }
  0x90   :  { %v76_v62 = vpop.xlane.xlu1 %75 }
  0x91   :  { %v101_v44 = vmul.f32 %v189_v34, %v100_v40  ;;  %v86_v46 = vadd.f32 %v187_v31, %v85_v41  ;;  %v80_v3 = vsub.f32 %v79_v61, %v76_v62 }
  0x93   :  { %v102_v50 = vadd.f32 %v189_v34, %v101_v44  ;;  %v90_v51 = vsel %vm89_vm10, %v187_v31, %v86_v46 }
  0x94   :  { %v95_v53 = vsel %vm92_vm12, %v94_v48, %v90_v51 }
  0x95   :  { %v106_v54 = vsel %vm105_vm13, %v189_v34, %v102_v50  ;;  %v96_v55 = vmul.f32 %v95_v53, %v56_v49 }
  0x96   :  { %v111_v57 = vsel %vm108_vm14, %v110_v52, %v106_v54 }
  0x97   :  { %v112_v58 = vmul.f32 %v111_v57, %v63_v38  ;;  %v121_v59 = vsub.f32 1.0, %v96_v55 }
  0x99   :  { %v125_v0 = vsub.f32 1.0, %v112_v58  ;;  %v122_v1 = vadd.f32 %v121_v59, %v120_v60 }
  0x9b   :  { %v126_v2 = vadd.f32 %v125_v0, %v124_v63  ;;  %v123_v4 = vsub.f32 0.0, %v122_v1 }
  0x9d   :  { %v127_v5 = vsub.f32 0.0, %v126_v2  ;;  %v128_v6 = vmul.f32 %v123_v4, %v76_v62 }
  0x9f   :  { %v129_v7 = vmul.f32 %v127_v5, %v80_v3 }
  0xa1   :  { %v130_v8 = vadd.f32 %v129_v7, %v128_v6 }
  0xa3   :  { %v139_v9 = vsel %vm138_vm15, %v130_v8, 0.0 }
  0xa4   :  { %140 = vadd.xlane.f32.xlu2 %v139_v9 }
 0x117   :  { %v141_v10 = vpop.xlane.xlu2 %140 }
 0x118   :  { %v142_v11 = vrot.slane %v141_v10, 4 }
 0x11a   :  { %v143_v12 = vadd.f32 %v142_v11, %v141_v10 }
 0x11c   :  { %v144_v13 = vrot.slane %v143_v12, 2 }
 0x11e   :  { %v145_v14 = vadd.f32 %v144_v13, %v143_v12 }
 0x120   :  { %v146_v15 = vrot.slane %v145_v14, 1 }
 0x122   :  { %v147_v16 = vadd.f32 %v146_v15, %v145_v14 }
 0x124   :  { %173 = vpush %v147_v16 }
 0x155   :  { %s174_s22 = spop %173 }
 0x156   :  { %v152_v19 = vstv %s174_s22 }
 0x157   :  { %v153_v20 = vsel %vm151_vm0, %v152_v19, 0.0 }
 0x158   :  { %154 = vst [vmem:[#allocation7] sm:$0x1] %v153_v20 }
 0x159   :  { %165 = dma.vmem_to_hbm [thread:$0]  %s161_s1, 16, %s163_s21, [#allocation4]  }
 0x15a   :  { %266 = dma.done.wait [#allocation4], 16  }
 0x15b   :  { %267 = vsyncadd [#allocation4], 4294967280 }
 0x15c   :  { %170 = vsyncpa [#allocation3], 1 }
 0x15d   :  { %171 = vsyncpa [#allocation6], 1 }
 0x15e   :  { %172 = vsyncpa [#allocation4], 1 }

</bundles_post_ra>
